<compile_context>
chip_gen: v6e
topology: v6e:2x2x1
jax: 0.10.0
libtpu: 0.0.40
codegen_flags: <defaults>
</compile_context>

<pallas_src>
import functools

import jax
import jax.numpy as jnp
from jax import lax
from jax.experimental import pallas as pl
from jax.experimental.pallas import tpu as pltpu


def _round_up(v, m):
    return (v + m - 1) // m * m


def _cross_conv_kernel(x_ref, w_ref, b_ref, o_ref, *, W, HW):
    # x_ref: (Nb, Cinp, HWp)   Nb images, channels padded to x8, spatial padded to x128
    # w_ref: (Cout, 5*Cinp)    K ordered tap-major: [center | up | down | left | right]
    # b_ref: (Cout, 1)
    # o_ref: (Nb, Cout, HWp)   lane-dense output
    Nb, _, HWp = x_ref.shape

    w = w_ref[...]
    b = b_ref[...]

    # Boundary masks vary only along the flattened-spatial (lane) axis: build
    # them once as (1, HWp) and let jnp.where broadcast over channels.
    lin = lax.broadcasted_iota(jnp.int32, (1, HWp), 1)   # flattened index h*W + w
    col = lin % W                                        # w coordinate
    m_up = lin >= W
    m_down = lin < HW - W
    m_left = col > 0
    m_right = col < W - 1

    zero = jnp.zeros((), x_ref.dtype)

    # Static unroll over the images in this block (Nb is small and static).
    for n in range(Nb):
        x = x_ref[n]                                                    # (Cinp, HWp)
        # out[h,w] taps x[h-1,w], x[h+1,w], x[h,w-1], x[h,w+1]; roll shifts the
        # flattened image on the XLU (shift s => result[j] = x[(j - s) mod HWp]).
        center = x
        up    = jnp.where(m_up,    pltpu.roll(x, shift=W,       axis=1), zero)
        down  = jnp.where(m_down,  pltpu.roll(x, shift=HWp - W, axis=1), zero)
        left  = jnp.where(m_left,  pltpu.roll(x, shift=1,       axis=1), zero)
        right = jnp.where(m_right, pltpu.roll(x, shift=HWp - 1, axis=1), zero)

        # Cin is padded to a multiple of 8, so the 5 taps fuse into a single
        # sublane-aligned K = 5*Cinp MXU matmul.
        x5 = jnp.concatenate((center, up, down, left, right), axis=0)   # (5*Cinp, HWp)
        acc = jnp.dot(w, x5, preferred_element_type=jnp.float32)        # (Cout, HWp)
        acc = acc + b                                                   # bias broadcast
        o_ref[n] = acc.astype(o_ref.dtype)


def cross_conv2d(x_nchw, weight, bias, *, images_per_block=None):
    """weight: (Cout, Cin, 5), bias: (Cout,), x: (N, Cin, H, W) -> (N, Cout, H, W)."""
    N, Cin, H, W = x_nchw.shape
    Cout = weight.shape[0]
    HW = H * W

    Cinp = _round_up(Cin, 8)      # sublane-align channels -> single fused matmul path
    HWp = _round_up(HW, 128)      # lane-dense (unmasked) stores for any image size

    itemsize = jnp.dtype(x_nchw.dtype).itemsize
    per_image_in = Cinp * HWp * itemsize
    if images_per_block is None:
        # Target a few hundred KiB per input block so the ~0.35us per-grid-step
        # overhead and tiny DMAs stop dominating; cap the static unroll at 8.
        target = 512 * 1024
        images_per_block = max(1, min(N, max(1, target // max(per_image_in, 1)), 8))
    Nb = images_per_block
    Np = _round_up(N, Nb)

    # Activation: free reshape + cheap zero-pad (batch / channel / spatial).
    x2 = x_nchw.reshape(N, Cin, HW)
    x2 = jnp.pad(x2, ((0, Np - N), (0, Cinp - Cin), (0, HWp - HW)))

    # Parameters: pad Cin with zero columns, then (Cout, Cin, 5) -> (Cout, 5*Cinp),
    # tap-major K matching the concat order [center|up|down|left|right].
    w_p = jnp.pad(weight, ((0, 0), (0, Cinp - Cin), (0, 0)))
    w2 = jnp.transpose(w_p, (0, 2, 1)).reshape(Cout, 5 * Cinp)
    b2 = bias.reshape(Cout, 1)

    # Explicit scoped-VMEM budget: double-buffered I/O blocks + tap temporaries
    # (5 taps + concat + f32 acc) with headroom; capped at 64 MiB (v7x-safe).
    in_block = Nb * Cinp * HWp * itemsize
    out_block = Nb * Cout * HWp * itemsize
    temps = Nb * HWp * 4 * (10 * Cinp + Cout)
    vmem_limit = int(min(max(2 * (in_block + out_block) + temps + (4 << 20),
                             16 << 20), 64 << 20))

    kernel = functools.partial(_cross_conv_kernel, W=W, HW=HW)
    out2 = pl.pallas_call(
        kernel,
        out_shape=jax.ShapeDtypeStruct((Np, Cout, HWp), x_nchw.dtype),
        grid=(Np // Nb,),
        in_specs=[
            pl.BlockSpec((Nb, Cinp, HWp), lambda g: (g, 0, 0)),
            pl.BlockSpec((Cout, 5 * Cinp), lambda g: (0, 0)),   # resident weight
            pl.BlockSpec((Cout, 1), lambda g: (0, 0)),          # resident bias
        ],
        out_specs=pl.BlockSpec((Nb, Cout, HWp), lambda g: (g, 0, 0)),
        compiler_params=pltpu.CompilerParams(
            dimension_semantics=("parallel",),
            vmem_limit_bytes=vmem_limit),
    )(x2, w2, b2)

    return out2[:N, :, :HW].reshape(N, Cout, H, W)


def _reference(x_nchw, weight, bias):
    """Pure-JAX reference: assemble the 3x3 cross kernel and run a dense conv."""
    Cout, Cin, _ = weight.shape
    k = jnp.zeros((Cout, Cin, 3, 3), dtype=weight.dtype)
    k = k.at[:, :, 1, 1].set(weight[:, :, 0])
    k = k.at[:, :, 0, 1].set(weight[:, :, 1])
    k = k.at[:, :, 2, 1].set(weight[:, :, 2])
    k = k.at[:, :, 1, 0].set(weight[:, :, 3])
    k = k.at[:, :, 1, 2].set(weight[:, :, 4])
    y = jax.lax.conv_general_dilated(
        x_nchw, k, window_strides=(1, 1), padding=((1, 1), (1, 1)),
        dimension_numbers=("NCHW", "OIHW", "NCHW"))
    return y + bias.reshape(1, Cout, 1, 1)


if __name__ == "__main__":
    batch, in_channels, out_channels, height, width = 2, 4, 8, 16, 16

    key = jax.random.PRNGKey(0)
    k_x, k_w = jax.random.split(key)
    x = jax.random.normal(k_x, (batch, in_channels, height, width), jnp.float32)
    weight = (jax.random.normal(k_w, (out_channels, in_channels, 5), jnp.float32)
              / (in_channels * 5) ** 0.5)
    bias = jnp.zeros((out_channels,), jnp.float32)

    out = cross_conv2d(x, weight, bias)
    out = jax.block_until_ready(out)

    ref = _reference(x, weight, bias)
    assert out.shape == (batch, out_channels, height, width)
    assert jnp.allclose(out, ref, atol=1e-5, rtol=1e-5), "mismatch vs reference"

    print("KERNEL_OK")
</pallas_src>

<mosaic_0001>
module attributes {stable_mosaic.version = 11 : i64} {
  func.func @_cross_conv_kernel(%arg0: i32, %arg1: memref<2x8x256xf32, #tpu.memory_space<vmem>>, %arg2: memref<8x40xf32, #tpu.memory_space<vmem>>, %arg3: memref<8x1xf32, #tpu.memory_space<vmem>>, %arg4: memref<2x8x256xf32, #tpu.memory_space<vmem>>) attributes {dimension_semantics = [#tpu.dimension_semantics<parallel>], iteration_bounds = array<i64: 1>, scalar_prefetch = 0 : i64, scratch_operands = 0 : i64, tpu.core_type = #tpu.core_type<tc>, window_params = [{transform_indices = @transform_0, window_bounds = array<i64: 2, 8, 256>}, {pipeline_mode = #tpu.pipeline_mode<synchronous>, transform_indices = @transform_1, window_bounds = array<i64: 8, 40>}, {pipeline_mode = #tpu.pipeline_mode<synchronous>, transform_indices = @transform_2, window_bounds = array<i64: 8, 1>}, {transform_indices = @transform_3, window_bounds = array<i64: 2, 8, 256>}]} {
    %c0 = arith.constant 0 : index
    %c0_0 = arith.constant 0 : index
    %0 = vector.load %arg2[%c0, %c0_0] : memref<8x40xf32, #tpu.memory_space<vmem>>, vector<8x40xf32>
    %c0_1 = arith.constant 0 : index
    %c0_2 = arith.constant 0 : index
    %1 = vector.load %arg3[%c0_1, %c0_2] : memref<8x1xf32, #tpu.memory_space<vmem>>, vector<8x1xf32>
    %2 = tpu.iota {dimensions = array<i32: 1>} : vector<1x256xi32>
    %c16_i32 = arith.constant 16 : i32
    %c0_i32 = arith.constant 0 : i32
    %3 = arith.cmpi eq, %c16_i32, %c0_i32 : i32
    %c1_i32 = arith.constant 1 : i32
    %4 = arith.select %3, %c1_i32, %c16_i32 : i32
    %5 = vector.broadcast %4 : i32 to vector<1x256xi32>
    %6 = arith.remsi %2, %5 : vector<1x256xi32>
    %c0_i32_3 = arith.constant 0 : i32
    %7 = vector.broadcast %c0_i32_3 : i32 to vector<1x256xi32>
    %8 = arith.cmpi ne, %6, %7 : vector<1x256xi32>
    %c0_i32_4 = arith.constant 0 : i32
    %9 = vector.broadcast %c0_i32_4 : i32 to vector<1x256xi32>
    %10 = arith.cmpi slt, %6, %9 : vector<1x256xi32>
    %c0_i32_5 = arith.constant 0 : i32
    %11 = arith.cmpi slt, %4, %c0_i32_5 : i32
    %12 = vector.broadcast %11 : i1 to vector<1x256xi1>
    %13 = vector.broadcast %12 : vector<1x256xi1> to vector<1x256xi1>
    %14 = arith.xori %10, %13 : vector<1x256xi1>
    %15 = arith.andi %14, %8 : vector<1x256xi1>
    %16 = vector.broadcast %4 : i32 to vector<1x256xi32>
    %17 = arith.addi %6, %16 : vector<1x256xi32>
    %18 = arith.select %15, %17, %6 : vector<1x256xi1>, vector<1x256xi32>
    %c16_i32_6 = arith.constant 16 : i32
    %19 = vector.broadcast %c16_i32_6 : i32 to vector<1x256xi32>
    %20 = arith.cmpi sge, %2, %19 : vector<1x256xi32>
    %c240_i32 = arith.constant 240 : i32
    %21 = vector.broadcast %c240_i32 : i32 to vector<1x256xi32>
    %22 = arith.cmpi slt, %2, %21 : vector<1x256xi32>
    %c0_i32_7 = arith.constant 0 : i32
    %23 = vector.broadcast %c0_i32_7 : i32 to vector<1x256xi32>
    %24 = arith.cmpi sgt, %18, %23 : vector<1x256xi32>
    %c15_i32 = arith.constant 15 : i32
    %25 = vector.broadcast %c15_i32 : i32 to vector<1x256xi32>
    %26 = arith.cmpi slt, %18, %25 : vector<1x256xi32>
    %c0_8 = arith.constant 0 : index
    %c0_9 = arith.constant 0 : index
    %c0_10 = arith.constant 0 : index
    %27 = vector.load %arg1[%c0_8, %c0_9, %c0_10] : memref<2x8x256xf32, #tpu.memory_space<vmem>>, vector<1x8x256xf32>
    %28 = vector.shape_cast %27 : vector<1x8x256xf32> to vector<8x256xf32>
    %c16_i32_11 = arith.constant 16 : i32
    %29 = tpu.dynamic_rotate %28 by %c16_i32_11 dim 1 : vector<8x256xf32>, i32 -> vector<8x256xf32>
    %cst = arith.constant 0.000000e+00 : f32
    %30 = vector.shape_cast %20 : vector<1x256xi1> to vector<1x256xi1>
    %31 = vector.broadcast %30 : vector<1x256xi1> to vector<8x256xi1>
    %32 = vector.broadcast %cst : f32 to vector<8x256xf32>
    %33 = arith.select %31, %29, %32 : vector<8x256xi1>, vector<8x256xf32>
    %c240_i32_12 = arith.constant 240 : i32
    %34 = tpu.dynamic_rotate %28 by %c240_i32_12 dim 1 : vector<8x256xf32>, i32 -> vector<8x256xf32>
    %cst_13 = arith.constant 0.000000e+00 : f32
    %35 = vector.shape_cast %22 : vector<1x256xi1> to vector<1x256xi1>
    %36 = vector.broadcast %35 : vector<1x256xi1> to vector<8x256xi1>
    %37 = vector.broadcast %cst_13 : f32 to vector<8x256xf32>
    %38 = arith.select %36, %34, %37 : vector<8x256xi1>, vector<8x256xf32>
    %c1_i32_14 = arith.constant 1 : i32
    %39 = tpu.dynamic_rotate %28 by %c1_i32_14 dim 1 : vector<8x256xf32>, i32 -> vector<8x256xf32>
    %cst_15 = arith.constant 0.000000e+00 : f32
    %40 = vector.shape_cast %24 : vector<1x256xi1> to vector<1x256xi1>
    %41 = vector.broadcast %40 : vector<1x256xi1> to vector<8x256xi1>
    %42 = vector.broadcast %cst_15 : f32 to vector<8x256xf32>
    %43 = arith.select %41, %39, %42 : vector<8x256xi1>, vector<8x256xf32>
    %c255_i32 = arith.constant 255 : i32
    %44 = tpu.dynamic_rotate %28 by %c255_i32 dim 1 : vector<8x256xf32>, i32 -> vector<8x256xf32>
    %cst_16 = arith.constant 0.000000e+00 : f32
    %45 = vector.shape_cast %26 : vector<1x256xi1> to vector<1x256xi1>
    %46 = vector.broadcast %45 : vector<1x256xi1> to vector<8x256xi1>
    %47 = vector.broadcast %cst_16 : f32 to vector<8x256xf32>
    %48 = arith.select %46, %44, %47 : vector<8x256xi1>, vector<8x256xf32>
    %49 = tpu.concatenate %28, %33, %38, %43, %48 in 0 : vector<8x256xf32>, vector<8x256xf32>, vector<8x256xf32>, vector<8x256xf32>, vector<8x256xf32> -> vector<40x256xf32>
    %cst_17 = arith.constant dense<0.000000e+00> : vector<8x256xf32>
    %50 = tpu.matmul %0, %49, %cst_17 {dimension_numbers = #tpu.dot_dimension_numbers<[1], [0], [0], [1], [0, 0, 1, 1], [], []>} : vector<8x40xf32>, vector<40x256xf32>, vector<8x256xf32> -> vector<8x256xf32>
    %51 = vector.broadcast %1 : vector<8x1xf32> to vector<8x256xf32>
    %52 = arith.addf %50, %51 : vector<8x256xf32>
    %c0_18 = arith.constant 0 : index
    %c0_19 = arith.constant 0 : index
    %c0_20 = arith.constant 0 : index
    %53 = vector.load %arg4[%c0_18, %c0_19, %c0_20] : memref<2x8x256xf32, #tpu.memory_space<vmem>>, vector<1x8x256xf32>
    %54 = vector.shape_cast %53 : vector<1x8x256xf32> to vector<8x256xf32>
    %55 = vector.shape_cast %52 : vector<8x256xf32> to vector<1x8x256xf32>
    tpu.vector_store %arg4[%c0_18, %c0_19, %c0_20], %55 {strides = array<i32>} : memref<2x8x256xf32, #tpu.memory_space<vmem>>, vector<1x8x256xf32>,
    %c1 = arith.constant 1 : index
    %c0_21 = arith.constant 0 : index
    %c0_22 = arith.constant 0 : index
    %56 = vector.load %arg1[%c1, %c0_21, %c0_22] : memref<2x8x256xf32, #tpu.memory_space<vmem>>, vector<1x8x256xf32>
    %57 = vector.shape_cast %56 : vector<1x8x256xf32> to vector<8x256xf32>
    %c16_i32_23 = arith.constant 16 : i32
    %58 = tpu.dynamic_rotate %57 by %c16_i32_23 dim 1 : vector<8x256xf32>, i32 -> vector<8x256xf32>
    %cst_24 = arith.constant 0.000000e+00 : f32
    %59 = vector.shape_cast %20 : vector<1x256xi1> to vector<1x256xi1>
    %60 = vector.broadcast %59 : vector<1x256xi1> to vector<8x256xi1>
    %61 = vector.broadcast %cst_24 : f32 to vector<8x256xf32>
    %62 = arith.select %60, %58, %61 : vector<8x256xi1>, vector<8x256xf32>
    %c240_i32_25 = arith.constant 240 : i32
    %63 = tpu.dynamic_rotate %57 by %c240_i32_25 dim 1 : vector<8x256xf32>, i32 -> vector<8x256xf32>
    %cst_26 = arith.constant 0.000000e+00 : f32
    %64 = vector.shape_cast %22 : vector<1x256xi1> to vector<1x256xi1>
    %65 = vector.broadcast %64 : vector<1x256xi1> to vector<8x256xi1>
    %66 = vector.broadcast %cst_26 : f32 to vector<8x256xf32>
    %67 = arith.select %65, %63, %66 : vector<8x256xi1>, vector<8x256xf32>
    %c1_i32_27 = arith.constant 1 : i32
    %68 = tpu.dynamic_rotate %57 by %c1_i32_27 dim 1 : vector<8x256xf32>, i32 -> vector<8x256xf32>
    %cst_28 = arith.constant 0.000000e+00 : f32
    %69 = vector.shape_cast %24 : vector<1x256xi1> to vector<1x256xi1>
    %70 = vector.broadcast %69 : vector<1x256xi1> to vector<8x256xi1>
    %71 = vector.broadcast %cst_28 : f32 to vector<8x256xf32>
    %72 = arith.select %70, %68, %71 : vector<8x256xi1>, vector<8x256xf32>
    %c255_i32_29 = arith.constant 255 : i32
    %73 = tpu.dynamic_rotate %57 by %c255_i32_29 dim 1 : vector<8x256xf32>, i32 -> vector<8x256xf32>
    %cst_30 = arith.constant 0.000000e+00 : f32
    %74 = vector.shape_cast %26 : vector<1x256xi1> to vector<1x256xi1>
    %75 = vector.broadcast %74 : vector<1x256xi1> to vector<8x256xi1>
    %76 = vector.broadcast %cst_30 : f32 to vector<8x256xf32>
    %77 = arith.select %75, %73, %76 : vector<8x256xi1>, vector<8x256xf32>
    %78 = tpu.concatenate %57, %62, %67, %72, %77 in 0 : vector<8x256xf32>, vector<8x256xf32>, vector<8x256xf32>, vector<8x256xf32>, vector<8x256xf32> -> vector<40x256xf32>
    %cst_31 = arith.constant dense<0.000000e+00> : vector<8x256xf32>
    %79 = tpu.matmul %0, %78, %cst_31 {dimension_numbers = #tpu.dot_dimension_numbers<[1], [0], [0], [1], [0, 0, 1, 1], [], []>} : vector<8x40xf32>, vector<40x256xf32>, vector<8x256xf32> -> vector<8x256xf32>
    %80 = vector.broadcast %1 : vector<8x1xf32> to vector<8x256xf32>
    %81 = arith.addf %79, %80 : vector<8x256xf32>
    %c1_32 = arith.constant 1 : index
    %c0_33 = arith.constant 0 : index
    %c0_34 = arith.constant 0 : index
    %82 = vector.load %arg4[%c1_32, %c0_33, %c0_34] : memref<2x8x256xf32, #tpu.memory_space<vmem>>, vector<1x8x256xf32>
    %83 = vector.shape_cast %82 : vector<1x8x256xf32> to vector<8x256xf32>
    %84 = vector.shape_cast %81 : vector<8x256xf32> to vector<1x8x256xf32>
    tpu.vector_store %arg4[%c1_32, %c0_33, %c0_34], %84 {strides = array<i32>} : memref<2x8x256xf32, #tpu.memory_space<vmem>>, vector<1x8x256xf32>,
    return
  }
  func.func @transform_0(%arg0: i32) -> (i32, i32, i32) {
    %c0_i32 = arith.constant 0 : i32
    %c0_i32_0 = arith.constant 0 : i32
    %c0_i32_1 = arith.constant 0 : i32
    return %arg0, %c0_i32, %c0_i32_0 : i32, i32, i32
  }
  func.func @transform_1(%arg0: i32) -> (i32, i32) {
    %c0_i32 = arith.constant 0 : i32
    %c0_i32_0 = arith.constant 0 : i32
    %c0_i32_1 = arith.constant 0 : i32
    return %c0_i32, %c0_i32_0 : i32, i32
  }
  func.func @transform_2(%arg0: i32) -> (i32, i32) {
    %c0_i32 = arith.constant 0 : i32
    %c0_i32_0 = arith.constant 0 : i32
    %c0_i32_1 = arith.constant 0 : i32
    return %c0_i32, %c0_i32_0 : i32, i32
  }
  func.func @transform_3(%arg0: i32) -> (i32, i32, i32) {
    %c0_i32 = arith.constant 0 : i32
    %c0_i32_0 = arith.constant 0 : i32
    %c0_i32_1 = arith.constant 0 : i32
    return %arg0, %c0_i32, %c0_i32_0 : i32, i32, i32
  }
}

</mosaic_0001>

<bundles_post_ra>
// kernel: tpu_custom_call.1
= control target key start
LH: loop header
LB: loop body
LE: loop exit
PB: predicated region body
PF: predicated region fallthrough
CT: control target
= control target key end

     0   :  { %8 = vsyncpa [#allocation3], 0  ;;  %s484_s0 = inlined_call_operand.hbm [shape: f32[2,8,256], index: 0, kind: input, shape index: {}]   ;;  %s485_s1 = inlined_call_operand.vmem [shape: f32[8,40], index: 1, kind: input, shape index: {}]   ;;  %s486_s2 = inlined_call_operand.vmem [shape: f32[8,1], index: 2, kind: input, shape index: {}]   ;;  %s487_s3 = inlined_call_operand.hbm [shape: f32[2,8,256], index: 3, kind: output, shape index: {}]  }
   0x1   :  { %9 = vsyncpa [#allocation4], 0  ;;  %s396_s12 = smov [#allocation2]  }
   0x2   :  { %s15_s13 = sshll.u32 %s396_s12, 4  ;;  %s16_s13 = int_to_ptr.vmem [resolvable:$true] %s15_s13 }
   0x3   :  { %s360_s14 = scalar_lea.vmem %s16_s13, 512  ;;  %p365_p1 = scmp.lt.s32.totalorder %s16_s13, %s16_s13 }
   0x4   :  { %p361_p0 = scmp.ne.s32.totalorder %s16_s13, %s360_s14  ;;  %p366_p2 = scmp.lt.s32.totalorder %s360_s14, %s360_s14 }
   0x6   :  { %p367_p3 = por %p366_p2, %p365_p1 }
   0x8   :  { %p368_p4 = pnand %p367_p3, %p361_p0 }
   0xa   :  { %371 = shalt.err (!%p368_p4)
}
   0xb   :  { %s397_s15 = smov 256   ;;  %s398_s16 = smov 16  }
   0xc   :  { %21 = dma.hbm_to_vmem [thread:$0]  %s484_s0, 512, %s16_s13, [#allocation3], %s397_s15, %s397_s15, %s398_s16  }
   0xd   :  { %392 = dma.done.wait [#allocation3], 512  }
   0xe   :  { %393 = vsyncadd [#allocation3], 4294966784  ;;  %v431_v0 = vld [vmem:[#allocation2 + $0x10] sm:$0xff]  ;;  %v433_v1 = vld [vmem:[#allocation2] sm:$0xff]  ;;  %s399_s19 = smov 127   ;;  %s400_s0 = smov 1   ;;  %v31_v7 = vlaneseq }
   0xf   :  { %229 = vrot.lane.b32.xlu1 %v431_v0, %s399_s19  ;;  %107 = vrot.lane.b32.xlu0 %v433_v1, %s399_s19  ;;  %v437_v2 = vld [vmem:[#allocation2 + $0x18] sm:$0xff]  ;;  %v439_v3 = vld [vmem:[#allocation2 + $0x8] sm:$0xff]  ;;  %s401_s20 = smov 112   ;;  %v402_v4 = vmov 0.0   ;;  %v403_v5 = vmov 0   ;;  %v30_v6 = vld [vmem:[%s486_s2] sm:$0xff] }
  0x10   :  { %193 = vmatprep.mubr.f32.mxu0 %v402_v4  ;;  %301 = vmatprep.mubr.f32.mxu1 %v402_v4  ;;  %v462_v8 = vand.u32 127, %v31_v7  ;;  %v29_v40 = vld [vmem:[%s485_s1] sm:$0xff]  ;;  %vm125_vm10 = vcmask 326656   ;;  %s404_s1 = smov [#allocation5]  }
  0x11   :  { %351 = vset.pattern.permute.xlu0 %v403_v5  ;;  %s316_s24 = sshll.u32 %s404_s1, 4  ;;  %s317_s24 = int_to_ptr.vmem [resolvable:$true] %s316_s24 }
  0x12   :  { %v33_v9 = vadd.s32 128, %v462_v8  ;;  %v38_v13 = vand.u32 15, %v462_v8  ;;  %vm111_vm0 = vcmp.lt.s32.totalorder %v462_v8, 127  ;;  %vm98_vm3 = vcmp.lt.s32.totalorder %v462_v8, 1  ;;  %s372_s25 = scalar_lea.vmem %s317_s24, 512  ;;  %p377_p6 = scmp.lt.s32.totalorder %s317_s24, %s317_s24 }
  0x13   :  { %231 = vrot.lane.b32.xlu1 %v437_v2, %s399_s19  ;;  %109 = vrot.lane.b32.xlu0 %v439_v3, %s399_s19  ;;  %vm85_vm6 = vcmp.lt.s32.totalorder %v462_v8, 112  ;;  %vm72_vm8 = vcmp.lt.s32.totalorder %v462_v8, 16  ;;  %vm58_vm9 = vcmp.ge.s32.totalorder %v462_v8, 16  ;;  %p373_p5 = scmp.ne.s32.totalorder %s317_s24, %s372_s25  ;;  %p378_p7 = scmp.lt.s32.totalorder %s372_s25, %s372_s25 }
  0x14   :  { %v45_v10 = vand.u32 15, %v33_v9  ;;  %vm64_vm2 = vcmp.lt.s32.totalorder %v38_v13, 15  ;;  %vm62_vm5 = vcmp.gt.s32.totalorder %v38_v13, 0  ;;  %vm61_vm7 = vcmp.lt.s32.totalorder %v33_v9, 240 }
  0x15   :  { %p379_p8 = por %p378_p7, %p377_p6 }
  0x16   :  { %vm65_vm1 = vcmp.lt.s32.totalorder %v45_v10, 15  ;;  %vm63_vm4 = vcmp.gt.s32.totalorder %v45_v10, 0 }
  0x17   :  { %96 = vrot.lane.b32.xlu1 %v439_v3, %s400_s0  ;;  %94 = vrot.lane.b32.xlu0 %v433_v1, %s400_s0  ;;  %p380_p9 = pnand %p379_p8, %p373_p5 }
  0x1b   :  { %223 = vrot.lane.b32.xlu1 %v437_v2, %s400_s0  ;;  %221 = vrot.lane.b32.xlu0 %v431_v0, %s400_s0 }
  0x1f   :  { %83 = vrot.lane.b32.xlu1 %v439_v3, %s401_s20  ;;  %81 = vrot.lane.b32.xlu0 %v433_v1, %s401_s20 }
  0x23   :  { %215 = vrot.lane.b32.xlu1 %v437_v2, %s401_s20  ;;  %213 = vrot.lane.b32.xlu0 %v431_v0, %s401_s20 }
  0x27   :  { %70 = vrot.lane.b32.xlu1 %v439_v3, %s398_s16  ;;  %68 = vrot.lane.b32.xlu0 %v433_v1, %s398_s16 }
  0x2b   :  { %207 = vrot.lane.b32.xlu1 %v437_v2, %s398_s16  ;;  %205 = vrot.lane.b32.xlu0 %v431_v0, %s398_s16 }
  0x2f   :  { %122 = vperm.xlu0 %351, %v30_v6  }
  0x81   :  { %v230_v11 = vpop.permute.xlu1 %229  ;;  %v108_v12 = vpop.permute.xlu0 %107 }
  0x85   :  { %v232_v14 = vpop.permute.xlu1 %231  ;;  %v110_v15 = vpop.permute.xlu0 %109 }
  0x86   :  { %v113_v16 = vsel %vm111_vm0, %v110_v15, %v108_v12  ;;  %v234_v17 = vsel %vm111_vm0, %v232_v14, %v230_v11  ;;  %v112_v18 = vsel %vm111_vm0, %v108_v12, %v110_v15  ;;  %v233_v19 = vsel %vm111_vm0, %v230_v11, %v232_v14 }
  0x87   :  { %328 = vmatprep.subr.msk.mxu0 %vm65_vm1, %v113_v16  ;;  %335 = vmatprep.subr.msk.mxu1 %vm65_vm1, %v234_v17 }
  0x88   :  { %329 = vmatpush1.msk.msra.mxu0 %vm64_vm2, %v112_v18  ;;  %336 = vmatpush1.msk.msra.mxu1 %vm64_vm2, %v233_v19 }
  0x89   :  { %v97_v20 = vpop.permute.xlu1 %96  ;;  %v95_v21 = vpop.permute.xlu0 %94 }
  0x8a   :  { %v99_v22 = vsel %vm98_vm3, %v95_v21, %v97_v20  ;;  %v100_v23 = vsel %vm98_vm3, %v97_v20, %v95_v21 }
  0x8b   :  { %330 = vmatprep.subr.msk.mxu0 %vm63_vm4, %v99_v22 }
  0x8c   :  { %331 = vmatpush1.msk.msra.mxu0 %vm62_vm5, %v100_v23 }
  0x8d   :  { %v224_v24 = vpop.permute.xlu1 %223  ;;  %v222_v25 = vpop.permute.xlu0 %221 }
  0x8e   :  { %v225_v26 = vsel %vm98_vm3, %v222_v25, %v224_v24  ;;  %v226_v27 = vsel %vm98_vm3, %v224_v24, %v222_v25 }
  0x8f   :  { %337 = vmatprep.subr.msk.mxu1 %vm63_vm4, %v225_v26 }
  0x90   :  { %338 = vmatpush1.msk.msra.mxu1 %vm62_vm5, %v226_v27 }
  0x91   :  { %v84_v28 = vpop.permute.xlu1 %83  ;;  %v82_v29 = vpop.permute.xlu0 %81 }
  0x92   :  { %v87_v30 = vsel %vm85_vm6, %v84_v28, %v82_v29  ;;  %v86_v31 = vsel %vm85_vm6, %v82_v29, %v84_v28 }
  0x93   :  { %332 = vmatprep.subr.msk.mxu0 %vm61_vm7, %v87_v30 }
  0x94   :  { %156 = vmatpush1.msra.mxu0 %v86_v31 }
  0x95   :  { %v216_v32 = vpop.permute.xlu1 %215  ;;  %v214_v33 = vpop.permute.xlu0 %213 }
  0x96   :  { %v218_v34 = vsel %vm85_vm6, %v216_v32, %v214_v33  ;;  %v217_v35 = vsel %vm85_vm6, %v214_v33, %v216_v32 }
  0x97   :  { %339 = vmatprep.subr.msk.mxu1 %vm61_vm7, %v218_v34 }
  0x98   :  { %264 = vmatpush1.msra.mxu1 %v217_v35 }
  0x99   :  { %v71_v36 = vpop.permute.xlu1 %70  ;;  %v69_v37 = vpop.permute.xlu0 %68 }
  0x9a   :  { %v74_v38 = vsel %vm72_vm8, %v71_v36, %v69_v37  ;;  %v73_v39 = vsel %vm72_vm8, %v69_v37, %v71_v36 }
  0x9b   :  { %157 = vmatprep.subr.mxu0 %v73_v39 }
  0x9c   :  { %333 = vmatpush1.msk.msra.mxu0 %vm58_vm9, %v74_v38 }
  0x9d   :  { %v208_v41 = vpop.permute.xlu1 %207  ;;  %v206_v42 = vpop.permute.xlu0 %205  ;;  %159 = vmatprep.subr.mxu0 %v439_v3 }
  0x9e   :  { %v210_v43 = vsel %vm72_vm8, %v208_v41, %v206_v42  ;;  %v209_v44 = vsel %vm72_vm8, %v206_v42, %v208_v41  ;;  %160 = vmatpush1.msra.mxu0 %v433_v1 }
  0x9f   :  { %265 = vmatprep.subr.mxu1 %v209_v44  ;;  %334 = vmatmul.mubr.msk.f32.vlgmr.msra.gmra.mxu0 %vm125_vm10, %v29_v40 }
  0xa0   :  { %340 = vmatpush1.msk.msra.mxu1 %vm58_vm9, %v210_v43 }
  0xa1   :  { %267 = vmatprep.subr.mxu1 %v437_v2 }
  0xa2   :  { %268 = vmatpush1.msra.mxu1 %v431_v0 }
  0xa3   :  { %341 = vmatmul.mubr.msk.f32.vlgmr.msra.gmra.mxu1 %vm125_vm10, %v29_v40 }
  0xaa   :  { %v123_v45 = vpop.permute.xlu0 %122 }
 0x15f   :  { %v195_v46 = vpop.f32.mrf.mxu0 }
 0x160   :  { %v196_v47 = vadd.f32 %v195_v46, %v123_v45 }
 0x161   :  { %v197_v48 = vpop.f32.mrf.mxu0 }
 0x162   :  { %200 = vst [vmem:[#allocation5] sm:$0xff] %v196_v47  ;;  %v198_v49 = vadd.f32 %v197_v48, %v123_v45 }
 0x163   :  { %v303_v50 = vpop.f32.mrf.mxu1 }
 0x164   :  { %201 = vst [vmem:[#allocation5 + $0x8] sm:$0xff] %v198_v49  ;;  %v304_v51 = vadd.f32 %v303_v50, %v123_v45 }
 0x165   :  { %v305_v52 = vpop.f32.mrf.mxu1 }
 0x166   :  { %309 = vst [vmem:[#allocation5 + $0x10] sm:$0xff] %v304_v51  ;;  %v306_v53 = vadd.f32 %v305_v52, %v123_v45 }
 0x168   :  { %310 = vst [vmem:[#allocation5 + $0x18] sm:$0xff] %v306_v53 }
 0x169   :  { %383 = shalt.err (!%p380_p9)
}
 0x16a   :  { %322 = dma.vmem_to_hbm [thread:$0]  %s317_s24, 512, %s487_s3, [#allocation4], %s397_s15, %s397_s15, %s398_s16  }
 0x16b   :  { %394 = dma.done.wait [#allocation4], 512  }
 0x16c   :  { %395 = vsyncadd [#allocation4], 4294966784 }
 0x16d   :  { %326 = vsyncpa [#allocation3], 1 }
 0x16e   :  { %327 = vsyncpa [#allocation4], 1 }

</bundles_post_ra>
